<compile_context>
chip_gen: v5e
topology: v5e:2x2
jax: 0.10.0
libtpu: 0.0.40
codegen_flags: <defaults>
</compile_context>

<pallas_src>
import jax
import jax.numpy as jnp
from jax.experimental import pallas as pl
from jax.experimental.pallas import tpu as pltpu

OBS = 4   # obs_shape
HID = 8   # fc1 out features
ACT = 2   # n_actions
B_TILE_MAX = 128


def simple_dense_kernel(p_ref, x_ref, out_ref):
    # p_ref:   SMEM (10,) f32 folded params:
    #            p[0:4]  = W_eff[0, :]   (action-0 weights)
    #            p[4:8]  = W_eff[1, :]   (action-1 weights)
    #            p[8]    = b_eff[0],  p[9] = b_eff[1]
    # x_ref:   VMEM (OBS, B_TILE) f32 observations, feature-major (batch on lanes)
    # out_ref: VMEM (1, B_TILE) int32 actions (lane-dense)
    x = x_ref[...]                                   # (OBS, B_TILE)

    acc0 = p_ref[0] * x[0:1, :]
    acc1 = p_ref[OBS + 0] * x[0:1, :]
    for i in range(1, OBS):                          # static unroll, OBS == 4
        acc0 = acc0 + p_ref[i] * x[i:i + 1, :]
        acc1 = acc1 + p_ref[OBS + i] * x[i:i + 1, :]
    logit0 = acc0 + p_ref[2 * OBS]                   # (1, B_TILE)
    logit1 = acc1 + p_ref[2 * OBS + 1]               # (1, B_TILE)

    # argmax over 2 actions; strict '>' keeps torch.argmax first-index-on-ties.
    out_ref[...] = (logit1 > logit0).astype(jnp.int32)


def init_params(key):
    """Deterministic init mimicking torch.nn.Linear default U(-1/sqrt(fan_in), +)."""
    k1, k2, k3, k4 = jax.random.split(key, 4)
    b1lim = 1.0 / jnp.sqrt(jnp.float32(OBS))
    b2lim = 1.0 / jnp.sqrt(jnp.float32(HID))
    w1 = jax.random.uniform(k1, (HID, OBS), jnp.float32, -b1lim, b1lim)  # (out, in) like torch
    b1 = jax.random.uniform(k2, (HID,), jnp.float32, -b1lim, b1lim)
    w2 = jax.random.uniform(k3, (ACT, HID), jnp.float32, -b2lim, b2lim)
    b2 = jax.random.uniform(k4, (ACT,), jnp.float32, -b2lim, b2lim)
    return w1, b1, w2, b2


def fold_and_pack(w1, b1, w2, b2):
    """Done ONCE at init/weight-assignment time.

    Folds fc1+fc2 (no activation between them in the torch module) into one affine map
    and flattens it into a 10-element f32 vector destined for SMEM.
    """
    w_eff = w2 @ w1                     # (ACT, OBS)
    b_eff = w2 @ b1 + b2                # (ACT,)
    return jnp.concatenate([w_eff.reshape(-1), b_eff]).astype(jnp.float32)  # (10,)


@jax.jit
def simple_dense_forward(x_t, packed_params):
    """Batched forward.

    x_t: (OBS, B) f32 observations, feature-major (B a multiple of 128 preferred).
    packed_params: (10,) f32 from fold_and_pack.
    Returns (1, B) int32 actions (lane-dense row).
    A single observation is just the B == 1 column case of the same math.
    """
    obs, b = x_t.shape
    assert obs == OBS
    b_tile = min(B_TILE_MAX, b)
    assert b % b_tile == 0, "batch must be a multiple of the tile (pad externally)"

    return pl.pallas_call(
        simple_dense_kernel,
        out_shape=jax.ShapeDtypeStruct((1, b), jnp.int32),
        grid=(b // b_tile,),
        in_specs=[
            # 40 B of folded params -> SMEM, whole array every iteration (no VMEM DMA).
            pl.BlockSpec(memory_space=pltpu.MemorySpace.SMEM),
            # Observations: one (OBS, b_tile) lane-dense tile per grid step.
            pl.BlockSpec((OBS, b_tile), lambda i: (0, i)),
        ],
        out_specs=pl.BlockSpec((1, b_tile), lambda i: (0, i)),
        compiler_params=pltpu.CompilerParams(
            # Batch tiles are independent -> shards across both TensorCores on v7x.
            dimension_semantics=("parallel",),
        ),
        cost_estimate=pl.CostEstimate(
            flops=b * (2 * OBS * ACT + ACT),
            transcendentals=0,
            bytes_accessed=(OBS * b + b + 10) * 4,
        ),
    )(packed_params, x_t)


def reference_forward(x_t, w1, b1, w2, b2):
    """Pure-JAX mirror of the torch module (fc1 -> fc2 -> softmax -> argmax), per sample."""
    x = x_t.T                                   # (B, OBS)
    h = x @ w1.T + b1                           # (B, HID)
    logits = h @ w2.T + b2                      # (B, ACT)
    probs = jax.nn.softmax(logits, axis=1)
    return jnp.argmax(probs, axis=1).astype(jnp.int32)   # (B,)


if __name__ == "__main__":
    key = jax.random.PRNGKey(0)
    kp, kx = jax.random.split(key)

    w1, b1, w2, b2 = init_params(kp)
    params = fold_and_pack(w1, b1, w2, b2)      # packed once; stays device-resident

    # Batch of observations, feature-major (OBS, B); B = 256 -> grid of two lane-dense tiles.
    B = 256
    x_t = jax.random.normal(kx, (OBS, B), jnp.float32)

    actions = simple_dense_forward(x_t, params)           # (1, B) int32
    actions = jax.block_until_ready(actions)

    ref = reference_forward(x_t, w1, b1, w2, b2)           # (B,)
    assert actions.shape == (1, B)
    assert bool(jnp.all(actions[0] == ref)), "pallas/reference action mismatch"

    # TODO(synk): torch's forward does a host-side numpy->tensor conversion per call;
    # here inputs are device arrays already, so that glue has no Pallas equivalent.
    print("KERNEL_OK")
</pallas_src>

<mosaic_0001>
module attributes {stable_mosaic.version = 11 : i64} {
  func.func @simple_dense_kernel(%arg0: i32, %arg1: memref<10xf32, #tpu.memory_space<smem>>, %arg2: memref<4x128xf32, #tpu.memory_space<vmem>>, %arg3: memref<1x128xi32, #tpu.memory_space<vmem>>) attributes {dimension_semantics = [#tpu.dimension_semantics<parallel>], iteration_bounds = array<i64: 2>, scalar_prefetch = 0 : i64, scratch_operands = 0 : i64, tpu.core_type = #tpu.core_type<tc>, window_params = [{transform_indices = @transform_0, window_bounds = array<i64: 10>}, {transform_indices = @transform_1, window_bounds = array<i64: 4, 128>}, {transform_indices = @transform_2, window_bounds = array<i64: 1, 128>}]} {
    %c0 = arith.constant 0 : index
    %c0_0 = arith.constant 0 : index
    %0 = vector.load %arg2[%c0, %c0_0] : memref<4x128xf32, #tpu.memory_space<vmem>>, vector<4x128xf32>
    %c0_1 = arith.constant 0 : index
    %1 = memref.load %arg1[%c0_1] : memref<10xf32, #tpu.memory_space<smem>>
    %2 = vector.extract_strided_slice %0 {offsets = [0, 0], sizes = [1, 128], strides = [1, 1]} : vector<4x128xf32> to vector<1x128xf32>
    %3 = vector.broadcast %1 : f32 to vector<1x128xf32>
    %4 = arith.mulf %3, %2 : vector<1x128xf32>
    %c4 = arith.constant 4 : index
    %5 = memref.load %arg1[%c4] : memref<10xf32, #tpu.memory_space<smem>>
    %6 = vector.extract_strided_slice %0 {offsets = [0, 0], sizes = [1, 128], strides = [1, 1]} : vector<4x128xf32> to vector<1x128xf32>
    %7 = vector.broadcast %5 : f32 to vector<1x128xf32>
    %8 = arith.mulf %7, %6 : vector<1x128xf32>
    %c1 = arith.constant 1 : index
    %9 = memref.load %arg1[%c1] : memref<10xf32, #tpu.memory_space<smem>>
    %10 = vector.extract_strided_slice %0 {offsets = [1, 0], sizes = [1, 128], strides = [1, 1]} : vector<4x128xf32> to vector<1x128xf32>
    %11 = vector.broadcast %9 : f32 to vector<1x128xf32>
    %12 = arith.mulf %11, %10 : vector<1x128xf32>
    %13 = arith.addf %4, %12 : vector<1x128xf32>
    %c5 = arith.constant 5 : index
    %14 = memref.load %arg1[%c5] : memref<10xf32, #tpu.memory_space<smem>>
    %15 = vector.extract_strided_slice %0 {offsets = [1, 0], sizes = [1, 128], strides = [1, 1]} : vector<4x128xf32> to vector<1x128xf32>
    %16 = vector.broadcast %14 : f32 to vector<1x128xf32>
    %17 = arith.mulf %16, %15 : vector<1x128xf32>
    %18 = arith.addf %8, %17 : vector<1x128xf32>
    %c2 = arith.constant 2 : index
    %19 = memref.load %arg1[%c2] : memref<10xf32, #tpu.memory_space<smem>>
    %20 = vector.extract_strided_slice %0 {offsets = [2, 0], sizes = [1, 128], strides = [1, 1]} : vector<4x128xf32> to vector<1x128xf32>
    %21 = vector.broadcast %19 : f32 to vector<1x128xf32>
    %22 = arith.mulf %21, %20 : vector<1x128xf32>
    %23 = arith.addf %13, %22 : vector<1x128xf32>
    %c6 = arith.constant 6 : index
    %24 = memref.load %arg1[%c6] : memref<10xf32, #tpu.memory_space<smem>>
    %25 = vector.extract_strided_slice %0 {offsets = [2, 0], sizes = [1, 128], strides = [1, 1]} : vector<4x128xf32> to vector<1x128xf32>
    %26 = vector.broadcast %24 : f32 to vector<1x128xf32>
    %27 = arith.mulf %26, %25 : vector<1x128xf32>
    %28 = arith.addf %18, %27 : vector<1x128xf32>
    %c3 = arith.constant 3 : index
    %29 = memref.load %arg1[%c3] : memref<10xf32, #tpu.memory_space<smem>>
    %30 = vector.extract_strided_slice %0 {offsets = [3, 0], sizes = [1, 128], strides = [1, 1]} : vector<4x128xf32> to vector<1x128xf32>
    %31 = vector.broadcast %29 : f32 to vector<1x128xf32>
    %32 = arith.mulf %31, %30 : vector<1x128xf32>
    %33 = arith.addf %23, %32 : vector<1x128xf32>
    %c7 = arith.constant 7 : index
    %34 = memref.load %arg1[%c7] : memref<10xf32, #tpu.memory_space<smem>>
    %35 = vector.extract_strided_slice %0 {offsets = [3, 0], sizes = [1, 128], strides = [1, 1]} : vector<4x128xf32> to vector<1x128xf32>
    %36 = vector.broadcast %34 : f32 to vector<1x128xf32>
    %37 = arith.mulf %36, %35 : vector<1x128xf32>
    %38 = arith.addf %28, %37 : vector<1x128xf32>
    %c8 = arith.constant 8 : index
    %39 = memref.load %arg1[%c8] : memref<10xf32, #tpu.memory_space<smem>>
    %40 = vector.broadcast %39 : f32 to vector<1x128xf32>
    %41 = arith.addf %33, %40 : vector<1x128xf32>
    %c9 = arith.constant 9 : index
    %42 = memref.load %arg1[%c9] : memref<10xf32, #tpu.memory_space<smem>>
    %43 = vector.broadcast %42 : f32 to vector<1x128xf32>
    %44 = arith.addf %38, %43 : vector<1x128xf32>
    %45 = arith.cmpf ogt, %44, %41 : vector<1x128xf32>
    %46 = arith.extui %45 : vector<1x128xi1> to vector<1x128xi32>
    %c0_2 = arith.constant 0 : index
    %c0_3 = arith.constant 0 : index
    %47 = vector.load %arg3[%c0_2, %c0_3] : memref<1x128xi32, #tpu.memory_space<vmem>>, vector<1x128xi32>
    tpu.vector_store %arg3[%c0_2, %c0_3], %46 {strides = array<i32>} : memref<1x128xi32, #tpu.memory_space<vmem>>, vector<1x128xi32>,
    return
  }
  func.func @transform_0(%arg0: i32) -> i32 {
    %c0_i32 = arith.constant 0 : i32
    %c0_i32_0 = arith.constant 0 : i32
    return %c0_i32 : i32
  }
  func.func @transform_1(%arg0: i32) -> (i32, i32) {
    %c0_i32 = arith.constant 0 : i32
    %c0_i32_0 = arith.constant 0 : i32
    return %c0_i32, %arg0 : i32, i32
  }
  func.func @transform_2(%arg0: i32) -> (i32, i32) {
    %c0_i32 = arith.constant 0 : i32
    %c0_i32_0 = arith.constant 0 : i32
    return %c0_i32, %arg0 : i32, i32
  }
}

</mosaic_0001>

<bundles_post_ra>
// kernel: simple_dense_forward.1
= control target key start
LH: loop header
LB: loop body
LE: loop exit
PB: predicated region body
PF: predicated region fallthrough
CT: control target
= control target key end

     0   :  { %7 = vsyncpa [#allocation5], 0  ;;  %s680_s0 = inlined_call_operand.hbm [shape: f32[10], index: 0, kind: input, shape index: {}]   ;;  %s681_s1 = inlined_call_operand.hbm [shape: f32[4,256], index: 1, kind: input, shape index: {}]   ;;  %s682_s2 = inlined_call_operand.hbm [shape: s32[1,256], index: 2, kind: output, shape index: {}]  }
   0x1   :  { %8 = vsyncpa [#allocation3], 0 }
   0x2   :  { %10 = vsyncpa [#allocation3 + $0x1], 0 }
   0x3   :  { %11 = vsyncpa [#allocation4], 0 }
   0x4   :  { %13 = vsyncpa [#allocation4 + $0x1], 0  ;;  %s535_s9 = smov 0   ;;  %s537_s10 = smov 0  }
   0x5   :  { %s539_s11 = smov 0   ;;  %s541_s12 = smov 0  }
   0x6 LB: > { %s556_s13 = sadd.s32 4294967295, %s516_s12   ;;  %s323_s14 = sadd.s32 4294967294, %s516_s12   ;;  %s516_s12 = sphi %s541_s12, %s692_s12   ;;  %s512_s11 = sphi %s539_s11, %s691_s11   ;;  %s508_s10 = sphi %s537_s10, %s690_s10   ;;  %s504_s9 = sphi %s535_s9, %s689_s9  }
   0x7   : > { %p60_p0 = scmp.ne.s32.totalorder %s508_s10, %s504_s9  ;;  %p61_p1 = scmp.eq.s32.totalorder %s556_s13, 0 }
   0x8   : > { %p84_p2 = scmp.eq.s32.totalorder %s556_s13, 1  ;;  %p90_p3 = scmp.eq.s32.totalorder %s323_s14, 1 }
   0x9   : > { %p565_p4 = por %p61_p1, %p60_p0  ;;  %p324_p5 = scmp.ge.s32.totalorder %s516_s12, 1 }
   0xa   : > { %p570_p6 = por %p90_p3, %p60_p0  ;;  %p97_p7 = scmp.lt.s32.totalorder %s516_s12, 3 }
   0xb   : > { %s109_s19 = sshll.u32 %s680_s0, 4  ;;  %s586_s21 = sadd.s32 1, %s516_s12   ;;  %s110_s19 = int_to_ptr.hbm [resolvable:$true] %s109_s19 }
   0xc   : > { %p578_p8 = pnand %p324_p5, %p97_p7  ;;  %s44_s22 = ssub.s32 %s516_s12, %s586_s21 }
   0xd   : > { %p45_p12 = scmp.eq.s32.totalorder %s44_s22, 0  ;;  %s47_s23 = sadd.s32 1, %s512_s11 }
   0xe   : > { %p351_p10 = pneg %p578_p8  ;;  %p54_p13 = scmp.ne.s32.totalorder %s512_s11, %s508_s10 }
   0xf   : > { %s518_s24 = smov [#allocation2]   ;;  %p55_p0 = scmp.eq.s32.totalorder %s516_s12, 0 }
  0x10   : > { %p352_p11 = pnand %p351_p10, %p61_p1  ;;  %p601_p3 = por %p84_p2, %p54_p13 }
  0x11   : > { %s596_s25 = scalar_select %p45_p12, %s512_s11, %s47_s23  }
  0x12   : > { %354 = dma.hbm_to_smem (!%p352_p11), %s110_s19, 16, %s518_s24, [#allocation5]  }
  0x13   : > { %s120_s27 = sand.u32 1, %s512_s11   ;;  %p56_p5 = por %p55_p0, %p54_p13 }
  0x14   : > { %p364_p7 = scmp.lt.s32.totalorder %s516_s12, 2  ;;  %s327_s28 = sshll.u32 %s120_s27, 2 }
  0x15   : > { %s328_s29 = sshll.u32 %s516_s12, 2  ;;  %s124_s6 = scalar_lea.vmem [#allocation6], %s327_s28 }
  0x16   : > { %s128_s4 = scalar_lea.hbm %s681_s1, %s328_s29  ;;  %s132_s7 = sshll.u32 %s124_s6, 4  ;;  %s133_s7 = int_to_ptr.vmem [resolvable:$true] %s132_s7 }
  0x17   : > { %s130_s5 = sshll.u32 %s128_s4, 4  ;;  %p611_p10 = pnand %p364_p7, %p56_p5  ;;  %s131_s5 = int_to_ptr.hbm [resolvable:$true] %s130_s5 }
  0x18   : > { %s121_s14 = scalar_lea.sflag [#allocation3], %s120_s27  ;;  %s416_s17 = sshra.s32 %s131_s5, 4  ;;  %s417_s17 = int_to_ptr.hbm [resolvable:$true] %s416_s17 }
  0x19   : > { %s418_s18 = scalar_lea.hbm %s417_s17, 4  ;;  %p420_p11 = pneg %p611_p10 }
  0x1a   : > { %p419_p2 = scmp.ne.s32.totalorder %s417_s17, %s418_s18  ;;  %s423_s23 = scalar_lea.hbm %s681_s1, 8 }
  0x1b   : > { %p424_p0 = scmp.lt.s32.totalorder %s417_s17, %s681_s1  ;;  %p425_p5 = scmp.lt.s32.totalorder %s423_s23, %s418_s18 }
  0x1c   : > { %p421_p12 = pnand %p420_p11, %p419_p2 }
  0x1d   : > { %p426_p7 = por %p425_p5, %p424_p0 }
  0x1e   : > { %p422_p13 = pneg %p421_p12 }
  0x20   : > { %p427_p9 = pnand %p426_p7, %p422_p13 }
  0x22   : > { %430 = shalt.err (!%p427_p9)
}
  0x23   : > { %358 = dma.hbm_to_vmem [thread:$0]  (!%p611_p10), %s131_s5, 64, %s133_s7, %s121_s14  }
  0x24   : > { %141 = sbr.rel (%p578_p8) target bundleno = 75 (0x4b), region = 28 }
  0x29   : > { %491 = dma.done.wait (%p61_p1), [#allocation5], 16  }
  0x2a   : > { %493 = vsyncadd (%p61_p1), [#allocation5], 4294967280  ;;  %s632_s27 = sand.u32 1, %s508_s10  }
  0x2b   : > { %s331_s29 = sshll.u32 %s632_s27, 2  ;;  %s149_s30 = scalar_lea.sflag [#allocation3], %s632_s27 }
  0x2c   : > { %s152_s3 = scalar_lea.vmem [#allocation6], %s331_s29 }
  0x2d   : > { %495 = dma.done.wait (%p565_p4), %s149_s30, 64  }
  0x2e   : > { %497 = vsyncadd (%p565_p4), %s149_s30, 4294967232 }
  0x2f   : > { %158 = sfence }
  0x30   : > { %s175_s20 = sld [smem:[#allocation2]]  ;;  %v174_v0 = vld [vmem:[%s152_s3] sm:$0xf]  ;;  %s241_s23 = scalar_lea.hbm %s682_s2, %s556_s13  ;;  %v519_v33 = vmov 0  }
  0x31   : > { %s332_s4 = sld [smem:[#allocation2 + $0x4]]  ;;  %s173_s24 = scalar_lea.vmem [#allocation7], %s632_s27 }
  0x32   : > { %s333_s5 = sld [smem:[#allocation2 + $0x1]]  ;;  %s243_s28 = sshll.u32 %s173_s24, 4  ;;  %s244_s28 = int_to_ptr.vmem [resolvable:$true] %s243_s28 }
  0x33   : > { %s334_s6 = sld [smem:[#allocation2 + $0x5]]  ;;  %s245_s29 = sshll.u32 %s241_s23, 4  ;;  %s246_s29 = int_to_ptr.hbm [resolvable:$true] %s245_s29 }
  0x34   : > { %s335_s7 = sld [smem:[#allocation2 + $0x2]]  ;;  %s233_s30 = scalar_lea.sflag [#allocation4], %s632_s27 }
  0x35   : > { %s336_s8 = sld [smem:[#allocation2 + $0x6]]  ;;  %s460_s3 = sshra.s32 %s246_s29, 4  ;;  %s461_s3 = int_to_ptr.hbm [resolvable:$true] %s460_s3 }
  0x36   : > { %v176_v1 = vstv %s175_s20  ;;  %s337_s14 = sld [smem:[#allocation2 + $0x3]]  ;;  %s462_s20 = scalar_lea.hbm %s461_s3, 1 }
  0x37   : > { %v179_v2 = vstv %s332_s4  ;;  %s338_s17 = sld [smem:[#allocation2 + $0x7]]  ;;  %v177_v4 = vmul.f32 %v176_v1, %v174_v0  ;;  %p463_p1 = scmp.ne.s32.totalorder %s461_s3, %s462_s20 }
  0x38   : > { %v182_v3 = vstv %s333_s5  ;;  %s640_s18 = sld [smem:[#allocation2 + $0x8]]  ;;  %v180_v7 = vmul.f32 %v179_v2, %v174_v0  ;;  %s466_s5 = scalar_lea.hbm %s682_s2, 2 }
  0x39   : > { %v183_v5 = vmul.f32 %v182_v3, %v174_v0  ;;  %v189_v6 = vstv %s334_s6  ;;  %s642_s15 = sld [smem:[#allocation2 + $0x9]]  ;;  %p464_p4 = pnand %p463_p1, %p601_p3 }
  0x3a   : > { %v190_v8 = vmul.f32 %v189_v6, %v174_v0  ;;  %v196_v9 = vstv %s335_s7  ;;  %p467_p9 = scmp.lt.s32.totalorder %s461_s3, %s682_s2  ;;  %p468_p10 = scmp.lt.s32.totalorder %s466_s5, %s462_s20 }
  0x3b   : > { %v185_v10 = vrot.slane %v183_v5, 1  ;;  %v197_v11 = vmul.f32 %v196_v9, %v174_v0  ;;  %v203_v12 = vstv %s336_s8  ;;  %p465_p8 = pneg %p464_p4 }
  0x3c   : > { %v192_v13 = vrot.slane %v190_v8, 1  ;;  %v204_v14 = vmul.f32 %v203_v12, %v174_v0  ;;  %v210_v15 = vstv %s337_s14  ;;  %p469_p2 = por %p468_p10, %p467_p9 }
  0x3d   : > { %v187_v16 = vadd.f32 %v185_v10, %v177_v4  ;;  %v199_v17 = vrot.slane %v197_v11, 2  ;;  %v211_v18 = vmul.f32 %v210_v15, %v174_v0  ;;  %v217_v19 = vstv %s338_s17 }
  0x3e   : > { %v194_v20 = vadd.f32 %v192_v13, %v180_v7  ;;  %v206_v21 = vrot.slane %v204_v14, 2  ;;  %v218_v22 = vmul.f32 %v217_v19, %v174_v0  ;;  %v224_v27 = vstv %s640_s18  ;;  %p470_p11 = pnand %p469_p2, %p465_p8 }
  0x3f   : > { %v201_v23 = vadd.f32 %v199_v17, %v187_v16  ;;  %v213_v24 = vrot.slane %v211_v18, 3  ;;  %v227_v29 = vstv %s642_s15 }
  0x40   : > { %v208_v25 = vadd.f32 %v206_v21, %v194_v20  ;;  %v220_v26 = vrot.slane %v218_v22, 3 }
  0x41   : > { %v215_v28 = vadd.f32 %v213_v24, %v201_v23 }
  0x42   : > { %v222_v30 = vadd.f32 %v220_v26, %v208_v25 }
  0x43   : > { %v225_v31 = vadd.f32 %v224_v27, %v215_v28 }
  0x44   : > { %v228_v32 = vadd.f32 %v227_v29, %v222_v30 }
  0x46   : > { %vm229_vm0 = vcmp.gt.f32.partialorder %v228_v32, %v225_v31 }
  0x47   : > { %v230_v34 = vsel %vm229_vm0, 1, %v519_v33 }
  0x48   : > { %231 = vst [vmem:[%s173_s24] sm:$0x1] %v230_v34 }
  0x49   : > { %473 = shalt.err (!%p470_p11)
}
  0x4a   : > { %349 = dma.vmem_to_hbm [thread:$0]  (%p601_p3), %s244_s28, 16, %s246_s29, %s233_s30  }
  0x4b PF: > { %s257_s27 = sand.u32 1, %s504_s9   ;;  %p688_p12 = scmp.ge.s32.totalorder %s516_s12, 2 }
  0x4c   : > { %s258_s8 = scalar_lea.sflag [#allocation4], %s257_s27 }
  0x4d   : > { %p360_p13 = pnand %p688_p12, %p570_p6 }
  0x4f   : > { %p361_p0 = pneg %p360_p13 }
  0x51   : > { %499 = dma.done.wait (%p361_p0), %s258_s8, 16  }
  0x52   : > { %501 = vsyncadd (%p361_p0), %s258_s8, 4294967280  ;;  %p16_p5 = scmp.ge.s32.totalorder %s586_s21, 4   ;;  %s689_s9 = smov %s508_s10 }
  0x53   : > { %s690_s10 = smov %s512_s11  ;;  %s691_s11 = smov %s596_s25 }
  0x54   : > { %s692_s12 = smov %s586_s21  ;;  %18 = sbr.rel (!%p16_p5) target bundleno = 6 (0x6), region = 78 }
  0x59   :  { %263 = vsyncpa [#allocation3], 1 }
  0x5a   :  { %265 = vsyncpa [#allocation3 + $0x1], 1 }
  0x5b   :  { %266 = vsyncpa [#allocation4], 1 }
  0x5c   :  { %268 = vsyncpa [#allocation4 + $0x1], 1 }
  0x5d   :  { %269 = vsyncpa [#allocation5], 1 }
  0x5e   :  { %271 = vsyncpa [#allocation5 + $0x1], 1 }

</bundles_post_ra>
